<compile_context>
chip_gen: v7x
topology: tpu7x:2x2x1
jax: 0.10.0
libtpu: 0.0.40
codegen_flags: <defaults>
</compile_context>

<pallas_src>
import functools

import jax
import jax.numpy as jnp
from jax import lax
from jax.experimental import pallas as pl
from jax.experimental.pallas import tpu as pltpu


def _round_up(x, m):
    return ((x + m - 1) // m) * m


# ----------------------------- Pallas kernel ------------------------------ #
def _gated_conv_kernel(patch_ref, w_ref, b_ref, o_ref, *, c_split):
    # patch_ref: (K_pad, TILE_P) bf16 ; w_ref: (2*Cout_pad, K_pad) bf16
    # b_ref:     (2*Cout_pad, 1) f32  ; o_ref: (Cout_pad, TILE_P)
    acc = jnp.dot(w_ref[...], patch_ref[...],
                  preferred_element_type=jnp.float32)       # (2*Cout_pad, TILE_P)
    acc = acc + b_ref[...]                                  # bias, lane-broadcast
    feat = acc[:c_split, :]                                 # sublane-aligned split
    gate = acc[c_split:, :]
    o_ref[...] = (jax.nn.relu(feat) * jax.nn.sigmoid(gate)).astype(o_ref.dtype)


# ------------------------------ glue (JAX) -------------------------------- #
def _im2col_cndhw(x_pad, stride):
    """x_pad: (C, N, Dp, Hp, Wp), zero-padded by 1 per spatial side.
    Returns (27*C, P) patches with K ordered (kd,kh,kw,c), P ordered (n,d,h,w)."""
    C, N, Dp, Hp, Wp = x_pad.shape
    Do = (Dp - 3) // stride + 1
    Ho = (Hp - 3) // stride + 1
    Wo = (Wp - 3) // stride + 1
    cols = []
    for kd in range(3):
        for kh in range(3):
            for kw in range(3):
                cols.append(
                    x_pad[:, :,
                          kd: kd + stride * (Do - 1) + 1: stride,
                          kh: kh + stride * (Ho - 1) + 1: stride,
                          kw: kw + stride * (Wo - 1) + 1: stride])
    patches = jnp.stack(cols, axis=0)                        # (27, C, N, Do, Ho, Wo)
    patches = patches.reshape(27 * C, N * Do * Ho * Wo)      # (K, P)
    return patches, (N, Do, Ho, Wo)


def gated_conv3d(x_cndhw, wf, wg, bf, bg, stride, out_dtype, tile_p_max=512):
    """One fused GatedConv3dWithActivation on a (C, N, D, H, W) activation."""
    assert tile_p_max % 128 == 0
    c_out = wf.shape[0]
    c_pad = _round_up(c_out, 8)                    # sublane-aligned feature/gate split

    # Cast to bf16 BEFORE the 27x expansion so the im2col glue moves half the bytes
    # (no-op for layers >= 2, whose activations are already bf16).
    xp = jnp.pad(x_cndhw.astype(jnp.bfloat16),
                 ((0, 0), (0, 0), (1, 1), (1, 1), (1, 1)))   # padding=1
    patches, (n, do, ho, wo) = _im2col_cndhw(xp, stride)
    k_dim, p_rows = patches.shape

    # ---- tiling / padding for the MXU ------------------------------------
    k_pad = _round_up(k_dim, 128)                      # aligned contraction dim
    tile_p = min(tile_p_max, _round_up(p_rows, 128))   # lane-dense output tile
    p_pad = _round_up(p_rows, tile_p)
    patches = jnp.pad(patches, ((0, k_pad - k_dim), (0, p_pad - p_rows)))

    # torch (Cout, Cin, kd, kh, kw) -> (kd, kh, kw, Cin, Cout) -> (K, Cout);
    # matches the im2col row ordering (true cross-correlation).  Feature rows go
    # to [0:c_out], gate rows to [c_pad:c_pad+c_out] so the in-kernel split at
    # c_pad stays sublane-aligned for any channel count.
    w_f = jnp.transpose(wf, (2, 3, 4, 1, 0)).reshape(k_dim, c_out)
    w_g = jnp.transpose(wg, (2, 3, 4, 1, 0)).reshape(k_dim, c_out)
    w = jnp.zeros((k_pad, 2 * c_pad), jnp.float32)
    w = w.at[:k_dim, :c_out].set(w_f)
    w = w.at[:k_dim, c_pad:c_pad + c_out].set(w_g)
    w = jnp.transpose(w, (1, 0)).astype(jnp.bfloat16)        # (2*Cout_pad, K_pad)

    b = jnp.zeros((2 * c_pad,), jnp.float32)
    b = b.at[:c_out].set(bf).at[c_pad:c_pad + c_out].set(bg)
    b = b.reshape(2 * c_pad, 1)

    grid = (p_pad // tile_p,)
    out_itemsize = jnp.dtype(out_dtype).itemsize
    cost = pl.CostEstimate(
        flops=int(2 * p_pad * k_pad * 2 * c_pad),
        transcendentals=int(p_pad * c_pad),
        bytes_accessed=int(patches.size * 2 + w.size * 2 + b.size * 4
                           + c_pad * p_pad * out_itemsize),
    )
    # VMEM budget: double-buffered patch tile + tiny weights/bias + output tile.
    block_bytes = (k_pad * tile_p * 2 + 2 * c_pad * k_pad * 2
                   + 2 * c_pad * 4 + c_pad * tile_p * 4)
    vmem_limit = min(48 * 1024 * 1024, max(8 * block_bytes, 32 * 1024 * 1024))

    out = pl.pallas_call(
        functools.partial(_gated_conv_kernel, c_split=c_pad),
        out_shape=jax.ShapeDtypeStruct((c_pad, p_pad), out_dtype),
        grid_spec=pltpu.PrefetchScalarGridSpec(
            num_scalar_prefetch=0,
            grid=grid,
            in_specs=[
                pl.BlockSpec((k_pad, tile_p), lambda i: (0, i)),
                # weights / bias are grid-invariant (block index constant -> no
                # re-DMA) and only a few KiB.
                pl.BlockSpec((2 * c_pad, k_pad), lambda i: (0, 0)),
                pl.BlockSpec((2 * c_pad, 1), lambda i: (0, 0)),
            ],
            out_specs=pl.BlockSpec((c_pad, tile_p), lambda i: (0, i)),
        ),
        compiler_params=pltpu.CompilerParams(
            dimension_semantics=("parallel",),
            vmem_limit_bytes=int(vmem_limit)),
        cost_estimate=cost,
    )(patches, w, b)

    return out[:c_out, :p_rows].reshape(c_out, n, do, ho, wo)


def down_block_forward(x_ncdhw, params, stride, tile_p_max=512):
    """DownBlock.forward: sequential gated convs (first with `stride`, rest 1)."""
    x = jnp.swapaxes(x_ncdhw, 0, 1)                    # NCDHW -> CNDHW
    n_layers = len(params)
    for li, (wf, wg, bf, bg) in enumerate(params):
        s = stride if li == 0 else 1
        out_dtype = x_ncdhw.dtype if li == n_layers - 1 else jnp.bfloat16
        x = gated_conv3d(x, wf, wg, bf, bg, s, out_dtype, tile_p_max)
    return jnp.swapaxes(x, 0, 1)                       # CNDHW -> NCDHW


# ------------------------- parameter construction ------------------------- #
def init_down_block_params(key, in_channels, out_channels, n_layers, bias):
    params = []
    c_in = in_channels
    for _ in range(n_layers):
        key, k1, k2, k3, k4 = jax.random.split(key, 5)
        scale = 1.0 / jnp.sqrt(jnp.float32(c_in * 27))
        wf = jax.random.uniform(k1, (out_channels, c_in, 3, 3, 3), jnp.float32,
                                -scale, scale)
        wg = jax.random.uniform(k2, (out_channels, c_in, 3, 3, 3), jnp.float32,
                                -scale, scale)
        if bias:
            bf = jax.random.uniform(k3, (out_channels,), jnp.float32, -scale, scale)
            bg = jax.random.uniform(k4, (out_channels,), jnp.float32, -scale, scale)
        else:
            bf = jnp.zeros((out_channels,), jnp.float32)
            bg = jnp.zeros((out_channels,), jnp.float32)
        params.append((wf, wg, bf, bg))
        c_in = out_channels
    return params


# --------------------------- pure-JAX reference ---------------------------- #
def _ref_gated_conv(x_ncdhw, wf, wg, bf, bg, stride):
    dn = lax.conv_dimension_numbers(x_ncdhw.shape, wf.shape,
                                    ("NCDHW", "OIDHW", "NCDHW"))
    f = lax.conv_general_dilated(x_ncdhw, wf, (stride,) * 3, [(1, 1)] * 3,
                                 dimension_numbers=dn) + bf.reshape(1, -1, 1, 1, 1)
    g = lax.conv_general_dilated(x_ncdhw, wg, (stride,) * 3, [(1, 1)] * 3,
                                 dimension_numbers=dn) + bg.reshape(1, -1, 1, 1, 1)
    return jax.nn.relu(f) * jax.nn.sigmoid(g)


def _ref_down_block(x_ncdhw, params, stride):
    x = x_ncdhw
    for li, (wf, wg, bf, bg) in enumerate(params):
        x = _ref_gated_conv(x, wf, wg, bf, bg, stride if li == 0 else 1)
    return x


# --------------------------------- main ------------------------------------ #
if __name__ == "__main__":
    IN_CH, OUT_CH = 4, 8
    STRIDE = 2
    N_LAYERS = 2
    BIAS = True
    N, D, H, W = 2, 16, 16, 16

    key = jax.random.PRNGKey(0)
    kx, kp = jax.random.split(key)
    x = jax.random.normal(kx, (N, IN_CH, D, H, W), jnp.float32)   # PyTorch NCDHW
    params = init_down_block_params(kp, IN_CH, OUT_CH, N_LAYERS, BIAS)

    fwd = jax.jit(functools.partial(down_block_forward, stride=STRIDE))
    out = jax.block_until_ready(fwd(x, params))

    ref = _ref_down_block(x, params, STRIDE)
    assert out.shape == ref.shape == (N, OUT_CH, D // STRIDE, H // STRIDE, W // STRIDE)
    # bf16 MXU inputs + bf16 inter-layer activations -> slightly looser tolerance
    # than a pure-f32 comparison (typical error is ~1e-3 absolute).
    assert jnp.allclose(out, ref, atol=5e-2, rtol=5e-2), "mismatch vs reference"

    print("KERNEL_OK")
</pallas_src>

<mosaic_0001>
module attributes {stable_mosaic.version = 11 : i64} {
  func.func @_gated_conv_kernel(%arg0: i32, %arg1: memref<128x512xbf16, #tpu.memory_space<vmem>>, %arg2: memref<16x128xbf16, #tpu.memory_space<vmem>>, %arg3: memref<16x1xf32, #tpu.memory_space<vmem>>, %arg4: memref<8x512xbf16, #tpu.memory_space<vmem>>) attributes {dimension_semantics = [#tpu.dimension_semantics<parallel>], iteration_bounds = array<i64: 2>, scalar_prefetch = 0 : i64, scratch_operands = 0 : i64, tpu.core_type = #tpu.core_type<tc>, window_params = [{transform_indices = @transform_0, window_bounds = array<i64: 128, 512>}, {pipeline_mode = #tpu.pipeline_mode<synchronous>, transform_indices = @transform_1, window_bounds = array<i64: 16, 128>}, {pipeline_mode = #tpu.pipeline_mode<synchronous>, transform_indices = @transform_2, window_bounds = array<i64: 16, 1>}, {transform_indices = @transform_3, window_bounds = array<i64: 8, 512>}]} {
    %c0 = arith.constant 0 : index
    %c0_0 = arith.constant 0 : index
    %0 = vector.load %arg2[%c0, %c0_0] : memref<16x128xbf16, #tpu.memory_space<vmem>>, vector<16x128xbf16>
    %c0_1 = arith.constant 0 : index
    %c0_2 = arith.constant 0 : index
    %1 = vector.load %arg1[%c0_1, %c0_2] : memref<128x512xbf16, #tpu.memory_space<vmem>>, vector<128x512xbf16>
    %cst = arith.constant dense<0.000000e+00> : vector<16x512xf32>
    %2 = tpu.matmul %0, %1, %cst {dimension_numbers = #tpu.dot_dimension_numbers<[1], [0], [0], [1], [0, 0, 1, 1], [], []>} : vector<16x128xbf16>, vector<128x512xbf16>, vector<16x512xf32> -> vector<16x512xf32>
    %c0_3 = arith.constant 0 : index
    %c0_4 = arith.constant 0 : index
    %3 = vector.load %arg3[%c0_3, %c0_4] : memref<16x1xf32, #tpu.memory_space<vmem>>, vector<16x1xf32>
    %4 = vector.broadcast %3 : vector<16x1xf32> to vector<16x512xf32>
    %5 = arith.addf %2, %4 : vector<16x512xf32>
    %6 = vector.extract_strided_slice %5 {offsets = [0, 0], sizes = [8, 512], strides = [1, 1]} : vector<16x512xf32> to vector<8x512xf32>
    %7 = vector.extract_strided_slice %5 {offsets = [8, 0], sizes = [8, 512], strides = [1, 1]} : vector<16x512xf32> to vector<8x512xf32>
    %cst_5 = arith.constant 0.000000e+00 : f32
    %8 = vector.broadcast %cst_5 : f32 to vector<8x512xf32>
    %9 = arith.maximumf %6, %8 : vector<8x512xf32>
    %10 = arith.negf %7 : vector<8x512xf32>
    %11 = math.exp %10 : vector<8x512xf32>
    %cst_6 = arith.constant 1.000000e+00 : f32
    %12 = vector.broadcast %cst_6 : f32 to vector<8x512xf32>
    %13 = arith.addf %12, %11 : vector<8x512xf32>
    %14 = arith.divf %12, %13 : vector<8x512xf32>
    %15 = arith.mulf %9, %14 : vector<8x512xf32>
    %16 = arith.truncf %15 : vector<8x512xf32> to vector<8x512xbf16>
    %c0_7 = arith.constant 0 : index
    %c0_8 = arith.constant 0 : index
    %17 = vector.load %arg4[%c0_7, %c0_8] : memref<8x512xbf16, #tpu.memory_space<vmem>>, vector<8x512xbf16>
    tpu.vector_store %arg4[%c0_7, %c0_8], %16 {strides = array<i32>} : memref<8x512xbf16, #tpu.memory_space<vmem>>, vector<8x512xbf16>,
    return
  }
  func.func @transform_0(%arg0: i32) -> (i32, i32) {
    %c0_i32 = arith.constant 0 : i32
    %c0_i32_0 = arith.constant 0 : i32
    return %c0_i32, %arg0 : i32, i32
  }
  func.func @transform_1(%arg0: i32) -> (i32, i32) {
    %c0_i32 = arith.constant 0 : i32
    %c0_i32_0 = arith.constant 0 : i32
    %c0_i32_1 = arith.constant 0 : i32
    return %c0_i32, %c0_i32_0 : i32, i32
  }
  func.func @transform_2(%arg0: i32) -> (i32, i32) {
    %c0_i32 = arith.constant 0 : i32
    %c0_i32_0 = arith.constant 0 : i32
    %c0_i32_1 = arith.constant 0 : i32
    return %c0_i32, %c0_i32_0 : i32, i32
  }
  func.func @transform_3(%arg0: i32) -> (i32, i32) {
    %c0_i32 = arith.constant 0 : i32
    %c0_i32_0 = arith.constant 0 : i32
    return %c0_i32, %arg0 : i32, i32
  }
}

module attributes {stable_mosaic.version = 11 : i64} {
  func.func @_gated_conv_kernel(%arg0: i32, %arg1: memref<256x512xbf16, #tpu.memory_space<vmem>>, %arg2: memref<16x256xbf16, #tpu.memory_space<vmem>>, %arg3: memref<16x1xf32, #tpu.memory_space<vmem>>, %arg4: memref<8x512xf32, #tpu.memory_space<vmem>>) attributes {dimension_semantics = [#tpu.dimension_semantics<parallel>], iteration_bounds = array<i64: 2>, scalar_prefetch = 0 : i64, scratch_operands = 0 : i64, tpu.core_type = #tpu.core_type<tc>, window_params = [{transform_indices = @transform_0, window_bounds = array<i64: 256, 512>}, {pipeline_mode = #tpu.pipeline_mode<synchronous>, transform_indices = @transform_1, window_bounds = array<i64: 16, 256>}, {pipeline_mode = #tpu.pipeline_mode<synchronous>, transform_indices = @transform_2, window_bounds = array<i64: 16, 1>}, {transform_indices = @transform_3, window_bounds = array<i64: 8, 512>}]} {
    %c0 = arith.constant 0 : index
    %c0_0 = arith.constant 0 : index
    %0 = vector.load %arg2[%c0, %c0_0] : memref<16x256xbf16, #tpu.memory_space<vmem>>, vector<16x256xbf16>
    %c0_1 = arith.constant 0 : index
    %c0_2 = arith.constant 0 : index
    %1 = vector.load %arg1[%c0_1, %c0_2] : memref<256x512xbf16, #tpu.memory_space<vmem>>, vector<256x512xbf16>
    %cst = arith.constant dense<0.000000e+00> : vector<16x512xf32>
    %2 = tpu.matmul %0, %1, %cst {dimension_numbers = #tpu.dot_dimension_numbers<[1], [0], [0], [1], [0, 0, 1, 1], [], []>} : vector<16x256xbf16>, vector<256x512xbf16>, vector<16x512xf32> -> vector<16x512xf32>
    %c0_3 = arith.constant 0 : index
    %c0_4 = arith.constant 0 : index
    %3 = vector.load %arg3[%c0_3, %c0_4] : memref<16x1xf32, #tpu.memory_space<vmem>>, vector<16x1xf32>
    %4 = vector.broadcast %3 : vector<16x1xf32> to vector<16x512xf32>
    %5 = arith.addf %2, %4 : vector<16x512xf32>
    %6 = vector.extract_strided_slice %5 {offsets = [0, 0], sizes = [8, 512], strides = [1, 1]} : vector<16x512xf32> to vector<8x512xf32>
    %7 = vector.extract_strided_slice %5 {offsets = [8, 0], sizes = [8, 512], strides = [1, 1]} : vector<16x512xf32> to vector<8x512xf32>
    %cst_5 = arith.constant 0.000000e+00 : f32
    %8 = vector.broadcast %cst_5 : f32 to vector<8x512xf32>
    %9 = arith.maximumf %6, %8 : vector<8x512xf32>
    %10 = arith.negf %7 : vector<8x512xf32>
    %11 = math.exp %10 : vector<8x512xf32>
    %cst_6 = arith.constant 1.000000e+00 : f32
    %12 = vector.broadcast %cst_6 : f32 to vector<8x512xf32>
    %13 = arith.addf %12, %11 : vector<8x512xf32>
    %14 = arith.divf %12, %13 : vector<8x512xf32>
    %15 = arith.mulf %9, %14 : vector<8x512xf32>
    %c0_7 = arith.constant 0 : index
    %c0_8 = arith.constant 0 : index
    %16 = vector.load %arg4[%c0_7, %c0_8] : memref<8x512xf32, #tpu.memory_space<vmem>>, vector<8x512xf32>
    tpu.vector_store %arg4[%c0_7, %c0_8], %15 {strides = array<i32>} : memref<8x512xf32, #tpu.memory_space<vmem>>, vector<8x512xf32>,
    return
  }
  func.func @transform_0(%arg0: i32) -> (i32, i32) {
    %c0_i32 = arith.constant 0 : i32
    %c0_i32_0 = arith.constant 0 : i32
    return %c0_i32, %arg0 : i32, i32
  }
  func.func @transform_1(%arg0: i32) -> (i32, i32) {
    %c0_i32 = arith.constant 0 : i32
    %c0_i32_0 = arith.constant 0 : i32
    %c0_i32_1 = arith.constant 0 : i32
    return %c0_i32, %c0_i32_0 : i32, i32
  }
  func.func @transform_2(%arg0: i32) -> (i32, i32) {
    %c0_i32 = arith.constant 0 : i32
    %c0_i32_0 = arith.constant 0 : i32
    %c0_i32_1 = arith.constant 0 : i32
    return %c0_i32, %c0_i32_0 : i32, i32
  }
  func.func @transform_3(%arg0: i32) -> (i32, i32) {
    %c0_i32 = arith.constant 0 : i32
    %c0_i32_0 = arith.constant 0 : i32
    return %c0_i32, %arg0 : i32, i32
  }
}

</mosaic_0001>

<bundles_post_ra>
// kernel: down_block_forward.2
= control target key start
LH: loop header
LB: loop body
LE: loop exit
PB: predicated region body
PF: predicated region fallthrough
CT: control target
= control target key end

     0   :  { %s857_s12 = smov 0   ;;  %s859_s13 = smov 0   ;;  %s1020_s0 = inlined_call_operand.vmem [shape: bf16[128,1024], index: 0, kind: input, shape index: {}]   ;;  %s1021_s1 = inlined_call_operand.vmem [shape: bf16[16,128], index: 1, kind: input, shape index: {}]   ;;  %s1022_s2 = inlined_call_operand.vmem [shape: f32[16,1], index: 2, kind: input, shape index: {}]   ;;  %s1023_s3 = inlined_call_operand.vmem [shape: bf16[8,1024], index: 3, kind: output, shape index: {}]  }
   0x1   :  { %s861_s14 = smov 0  }
   0x2 LB: > { %s666_s15 = sadd.s32 4294967295, %s834_s14   ;;  %s874_s16 = sadd.s32 1, %s834_s14   ;;  %s834_s14 = sphi %s861_s14, %s1026_s14   ;;  %s830_s13 = sphi %s859_s13, %s1025_s13   ;;  %s826_s12 = sphi %s857_s12, %s1024_s12  }
   0x3   : > { %s17_s17 = ssub.s32 %s834_s14, %s874_s16  ;;  %s20_s18 = sadd.s32 1, %s830_s13 }
   0x4   : > { %p18_p0 = scmp.eq.s32.totalorder %s17_s17, 0  ;;  %p27_p1 = scmp.ne.s32.totalorder %s830_s13, %s826_s12 }
   0x5   : > { %p28_p2 = scmp.eq.s32.totalorder %s834_s14, 0  ;;  %p669_p4 = scmp.ge.s32.totalorder %s834_s14, 2 }
   0x6   : > { %s883_s19 = scalar_select %p18_p0, %s830_s13, %s20_s18  }
   0x7   : > { %p29_p3 = por %p28_p2, %p27_p1  ;;  %127 = sbr.rel (%p669_p4) target bundleno = 34 (0x22), region = 24 }
   0xe   : > { %130 = sbr.rel (!%p29_p3) target bundleno = 34 (0x22), region = 28  ;;  %s132_s20 = sand.u32 (%p29_p3), 1, %s830_s13  }
   0xf   : > { %s718_s21 = sshll.u32 (%p29_p3), %s834_s14, 4  ;;  %s670_s22 = sshll.u32 (%p29_p3), %s132_s20, 8 }
  0x10   : > { %s891_s25 = scalar_lea.vmem (%p29_p3), %s1020_s0, %s718_s21  ;;  %s896_s26 = scalar_lea.vmem (%p29_p3), [#allocation2], %s670_s22 }
  0x11   : > { %v150_v0 = vld [vmem:[%s891_s25] sm:$0xff] (%p29_p3)  ;;  %v152_v1 = vld [vmem:[%s891_s25 + $0x8] sm:$0xff] (%p29_p3) }
  0x12   : > { %v154_v2 = vld [vmem:[%s891_s25 + $0x20] sm:$0xff] (%p29_p3)  ;;  %151 = vst [vmem:[%s896_s26] sm:$0xff] (%p29_p3), %v150_v0  ;;  %153 = vst [vmem:[%s896_s26 + $0x8] sm:$0xff] (%p29_p3), %v152_v1  ;;  %v156_v3 = vld [vmem:[%s891_s25 + $0x28] sm:$0xff] (%p29_p3) }
  0x13   : > { %155 = vst [vmem:[%s896_s26 + $0x10] sm:$0xff] (%p29_p3), %v154_v2  ;;  %v158_v4 = vld [vmem:[%s891_s25 + $0x40] sm:$0xff] (%p29_p3)  ;;  %v160_v5 = vld [vmem:[%s891_s25 + $0x48] sm:$0xff] (%p29_p3)  ;;  %157 = vst [vmem:[%s896_s26 + $0x18] sm:$0xff] (%p29_p3), %v156_v3 }
  0x14   : > { %159 = vst [vmem:[%s896_s26 + $0x20] sm:$0xff] (%p29_p3), %v158_v4  ;;  %161 = vst [vmem:[%s896_s26 + $0x28] sm:$0xff] (%p29_p3), %v160_v5  ;;  %v162_v6 = vld [vmem:[%s891_s25 + $0x60] sm:$0xff] (%p29_p3)  ;;  %v164_v7 = vld [vmem:[%s891_s25 + $0x68] sm:$0xff] (%p29_p3) }
  0x15   : > { %v166_v8 = vld [vmem:[%s891_s25 + $0x80] sm:$0xff]  ;;  %163 = vst [vmem:[%s896_s26 + $0x30] sm:$0xff] %v162_v6  ;;  %165 = vst [vmem:[%s896_s26 + $0x38] sm:$0xff] %v164_v7  ;;  %v168_v9 = vld [vmem:[%s891_s25 + $0x88] sm:$0xff] }
  0x16   : > { %167 = vst [vmem:[%s896_s26 + $0x40] sm:$0xff] %v166_v8  ;;  %v170_v10 = vld [vmem:[%s891_s25 + $0xa0] sm:$0xff]  ;;  %v172_v11 = vld [vmem:[%s891_s25 + $0xa8] sm:$0xff]  ;;  %169 = vst [vmem:[%s896_s26 + $0x48] sm:$0xff] %v168_v9 }
  0x17   : > { %171 = vst [vmem:[%s896_s26 + $0x50] sm:$0xff] %v170_v10  ;;  %173 = vst [vmem:[%s896_s26 + $0x58] sm:$0xff] %v172_v11  ;;  %v174_v12 = vld [vmem:[%s891_s25 + $0xc0] sm:$0xff]  ;;  %v176_v13 = vld [vmem:[%s891_s25 + $0xc8] sm:$0xff] }
  0x18   : > { %v178_v14 = vld [vmem:[%s891_s25 + $0xe0] sm:$0xff]  ;;  %175 = vst [vmem:[%s896_s26 + $0x60] sm:$0xff] %v174_v12  ;;  %177 = vst [vmem:[%s896_s26 + $0x68] sm:$0xff] %v176_v13  ;;  %v180_v15 = vld [vmem:[%s891_s25 + $0xe8] sm:$0xff] }
  0x19   : > { %179 = vst [vmem:[%s896_s26 + $0x70] sm:$0xff] %v178_v14  ;;  %v182_v16 = vld [vmem:[%s891_s25 + $0x100] sm:$0xff]  ;;  %v184_v17 = vld [vmem:[%s891_s25 + $0x108] sm:$0xff]  ;;  %181 = vst [vmem:[%s896_s26 + $0x78] sm:$0xff] %v180_v15 }
  0x1a   : > { %183 = vst [vmem:[%s896_s26 + $0x80] sm:$0xff] %v182_v16  ;;  %185 = vst [vmem:[%s896_s26 + $0x88] sm:$0xff] %v184_v17  ;;  %v186_v18 = vld [vmem:[%s891_s25 + $0x120] sm:$0xff]  ;;  %v188_v19 = vld [vmem:[%s891_s25 + $0x128] sm:$0xff] }
  0x1b   : > { %v190_v20 = vld [vmem:[%s891_s25 + $0x140] sm:$0xff]  ;;  %187 = vst [vmem:[%s896_s26 + $0x90] sm:$0xff] %v186_v18  ;;  %189 = vst [vmem:[%s896_s26 + $0x98] sm:$0xff] %v188_v19  ;;  %v192_v21 = vld [vmem:[%s891_s25 + $0x148] sm:$0xff] }
  0x1c   : > { %191 = vst [vmem:[%s896_s26 + $0xa0] sm:$0xff] %v190_v20  ;;  %v194_v22 = vld [vmem:[%s891_s25 + $0x160] sm:$0xff]  ;;  %v196_v23 = vld [vmem:[%s891_s25 + $0x168] sm:$0xff]  ;;  %193 = vst [vmem:[%s896_s26 + $0xa8] sm:$0xff] %v192_v21 }
  0x1d   : > { %195 = vst [vmem:[%s896_s26 + $0xb0] sm:$0xff] %v194_v22  ;;  %197 = vst [vmem:[%s896_s26 + $0xb8] sm:$0xff] %v196_v23  ;;  %v198_v24 = vld [vmem:[%s891_s25 + $0x180] sm:$0xff]  ;;  %v200_v25 = vld [vmem:[%s891_s25 + $0x188] sm:$0xff] }
  0x1e   : > { %v202_v26 = vld [vmem:[%s891_s25 + $0x1a0] sm:$0xff]  ;;  %199 = vst [vmem:[%s896_s26 + $0xc0] sm:$0xff] %v198_v24  ;;  %201 = vst [vmem:[%s896_s26 + $0xc8] sm:$0xff] %v200_v25  ;;  %v204_v27 = vld [vmem:[%s891_s25 + $0x1a8] sm:$0xff] }
  0x1f   : > { %203 = vst [vmem:[%s896_s26 + $0xd0] sm:$0xff] %v202_v26  ;;  %v206_v28 = vld [vmem:[%s891_s25 + $0x1c0] sm:$0xff]  ;;  %v208_v29 = vld [vmem:[%s891_s25 + $0x1c8] sm:$0xff]  ;;  %205 = vst [vmem:[%s896_s26 + $0xd8] sm:$0xff] %v204_v27 }
  0x20   : > { %207 = vst [vmem:[%s896_s26 + $0xe0] sm:$0xff] %v206_v28  ;;  %209 = vst [vmem:[%s896_s26 + $0xe8] sm:$0xff] %v208_v29  ;;  %v210_v30 = vld [vmem:[%s891_s25 + $0x1e0] sm:$0xff]  ;;  %v212_v31 = vld [vmem:[%s891_s25 + $0x1e8] sm:$0xff] }
  0x21   : > { %211 = vst [vmem:[%s896_s26 + $0xf0] sm:$0xff] %v210_v30  ;;  %213 = vst [vmem:[%s896_s26 + $0xf8] sm:$0xff] %v212_v31 }
  0x22 PF: > { %p673_p5 = scmp.ge.s32.totalorder %s834_s14, 1  ;;  %p218_p6 = scmp.lt.s32.totalorder %s834_s14, 3 }
  0x24   : > { %p219_p7 = pnand %p673_p5, %p218_p6 }
  0x25   : > { %s225_s27 = sand.u32 (!%p219_p7), 1, %s826_s12   ;;  %v836_v32 = vmov (!%p219_p7), 0   ;;  %v291_v33 = vld [vmem:[%s1022_s2 + $0x8] sm:$0xff] (!%p219_p7)  ;;  %v290_v35 = vld [vmem:[%s1022_s2] sm:$0xff] (!%p219_p7)  ;;  %s675_s9 = sshll.u32 (!%p219_p7), %s666_s15, 2 }
  0x26   : > { %222 = sbr.rel (%p219_p7) target bundleno = 323 (0x143), region = 51  ;;  %s674_s28 = sshll.u32 (!%p219_p7), %s225_s27, 8  ;;  %500 = vmatprep.mubr.bf16.mxu0 (!%p219_p7), %v836_v32  ;;  %543 = vmatprep.mubr.bf16.mxu1 (!%p219_p7), %v836_v32  ;;  %v795_v3 = vld [vmem:[%s1021_s1] sm:$0xff] (!%p219_p7)  }
  0x27   : > { %746 = vset.pattern.permute.xlu0 (!%p219_p7), %v836_v32  ;;  %s965_s4 = scalar_lea.vmem (!%p219_p7), [#allocation2], %s674_s28  ;;  %p250_p8 = scmp.lt.s32.totalorder (!%p219_p7), %s675_s9, 7 }
  0x28   : > { %v747_v34 = vld [vmem:[%s965_s4 + $0x4] ss:$16 sps:$4 sm:$0xff] (!%p219_p7)   ;;  %299 = vperm.xlu0 (!%p219_p7), %746, %v291_v33   ;;  %v749_v36 = vld [vmem:[%s965_s4 + $0xc] ss:$16 sps:$4 sm:$0xff] (!%p219_p7)   ;;  %v751_v37 = vld [vmem:[%s965_s4] ss:$16 sps:$4 sm:$0xff] (!%p219_p7)  }
  0x29   : > { %468 = vmatprep.subr.bf16.mxu0 (!%p219_p7), %v747_v34  ;;  %v752_v38 = vld [vmem:[%s965_s4 + $0x8] ss:$16 sps:$4 sm:$0xff] (!%p219_p7)   ;;  %511 = vmatprep.subr.bf16.mxu1 (!%p219_p7), %v749_v36  ;;  %v753_v39 = vld [vmem:[%s965_s4 + $0x24] ss:$16 sps:$4 sm:$0xff] (!%p219_p7)   ;;  %v755_v40 = vld [vmem:[%s965_s4 + $0x2c] ss:$16 sps:$4 sm:$0xff] (!%p219_p7)  }
  0x2a   : > { %469 = vmatpush1.bf16.msra.mxu0 (!%p219_p7), %v751_v37  ;;  %512 = vmatpush1.bf16.msra.mxu1 (!%p219_p7), %v752_v38  ;;  %v757_v41 = vld [vmem:[%s965_s4 + $0x20] ss:$16 sps:$4 sm:$0xff] (!%p219_p7)   ;;  %v758_v42 = vld [vmem:[%s965_s4 + $0x28] ss:$16 sps:$4 sm:$0xff] (!%p219_p7)   ;;  %v759_v43 = vld [vmem:[%s965_s4 + $0x44] ss:$16 sps:$4 sm:$0xff] (!%p219_p7)  }
  0x2b   : > { %470 = vmatprep.subr.bf16.mxu0 (!%p219_p7), %v753_v39  ;;  %513 = vmatprep.subr.bf16.mxu1 (!%p219_p7), %v755_v40  ;;  %v761_v44 = vld [vmem:[%s965_s4 + $0x4c] ss:$16 sps:$4 sm:$0xff] (!%p219_p7)   ;;  %v763_v45 = vld [vmem:[%s965_s4 + $0x40] ss:$16 sps:$4 sm:$0xff] (!%p219_p7)   ;;  %v764_v46 = vld [vmem:[%s965_s4 + $0x48] ss:$16 sps:$4 sm:$0xff] (!%p219_p7)  }
  0x2c   : > { %294 = vperm.xlu0 (!%p219_p7), %746, %v290_v35   ;;  %v765_v47 = vld [vmem:[%s965_s4 + $0x64] ss:$16 sps:$4 sm:$0xff] (!%p219_p7)   ;;  %v767_v48 = vld [vmem:[%s965_s4 + $0x6c] ss:$16 sps:$4 sm:$0xff] (!%p219_p7)   ;;  %v769_v49 = vld [vmem:[%s965_s4 + $0x60] ss:$16 sps:$4 sm:$0xff] (!%p219_p7)  }
  0x2d   : > { %v770_v50 = vld [vmem:[%s965_s4 + $0x68] ss:$16 sps:$4 sm:$0xff]   ;;  %v771_v51 = vld [vmem:[%s965_s4 + $0x84] ss:$16 sps:$4 sm:$0xff]   ;;  %v773_v52 = vld [vmem:[%s965_s4 + $0x8c] ss:$16 sps:$4 sm:$0xff]  }
  0x2e   : > { %471 = vmatpush1.bf16.msra.mxu0 %v757_v41  ;;  %514 = vmatpush1.bf16.msra.mxu1 %v758_v42  ;;  %v775_v53 = vld [vmem:[%s965_s4 + $0x80] ss:$16 sps:$4 sm:$0xff]   ;;  %v776_v54 = vld [vmem:[%s965_s4 + $0x88] ss:$16 sps:$4 sm:$0xff]   ;;  %v777_v55 = vld [vmem:[%s965_s4 + $0xa4] ss:$16 sps:$4 sm:$0xff]  }
  0x2f   : > { %472 = vmatprep.subr.bf16.mxu0 %v759_v43  ;;  %515 = vmatprep.subr.bf16.mxu1 %v761_v44  ;;  %v779_v56 = vld [vmem:[%s965_s4 + $0xac] ss:$16 sps:$4 sm:$0xff]   ;;  %v781_v57 = vld [vmem:[%s965_s4 + $0xa0] ss:$16 sps:$4 sm:$0xff]   ;;  %v782_v58 = vld [vmem:[%s965_s4 + $0xa8] ss:$16 sps:$4 sm:$0xff]  }
  0x30   : > { %v783_v59 = vld [vmem:[%s965_s4 + $0xc4] ss:$16 sps:$4 sm:$0xff]   ;;  %v785_v60 = vld [vmem:[%s965_s4 + $0xcc] ss:$16 sps:$4 sm:$0xff]   ;;  %v787_v61 = vld [vmem:[%s965_s4 + $0xc0] ss:$16 sps:$4 sm:$0xff]  }
  0x31   : > { %v788_v62 = vld [vmem:[%s965_s4 + $0xc8] ss:$16 sps:$4 sm:$0xff]   ;;  %v789_v63 = vld [vmem:[%s965_s4 + $0xe4] ss:$16 sps:$4 sm:$0xff]   ;;  %v791_v0 = vld [vmem:[%s965_s4 + $0xec] ss:$16 sps:$4 sm:$0xff]  }
  0x32   : > { %473 = vmatpush1.bf16.msra.mxu0 %v763_v45  ;;  %516 = vmatpush1.bf16.msra.mxu1 %v764_v46  ;;  %v793_v1 = vld [vmem:[%s965_s4 + $0xe0] ss:$16 sps:$4 sm:$0xff]   ;;  %v794_v2 = vld [vmem:[%s965_s4 + $0xe8] ss:$16 sps:$4 sm:$0xff]   ;;  %s1028_s9 = smov (!%p250_p8, %s675_s9), 7 }
  0x33   : > { %474 = vmatprep.subr.bf16.mxu0 %v765_v47  ;;  %517 = vmatprep.subr.bf16.mxu1 %v767_v48  ;;  %s676_s10 = sshll.u32 %s1028_s9, 2 }
  0x34   : > { %s253_s14 = scalar_lea.vmem %s1023_s3, %s676_s10 }
  0x36   : > { %475 = vmatpush1.bf16.msra.mxu0 %v769_v49  ;;  %518 = vmatpush1.bf16.msra.mxu1 %v770_v50 }
  0x37   : > { %476 = vmatprep.subr.bf16.mxu0 %v771_v51  ;;  %519 = vmatprep.subr.bf16.mxu1 %v773_v52 }
  0x3a   : > { %477 = vmatpush1.bf16.msra.mxu0 %v775_v53  ;;  %520 = vmatpush1.bf16.msra.mxu1 %v776_v54 }
  0x3b   : > { %478 = vmatprep.subr.bf16.mxu0 %v777_v55  ;;  %521 = vmatprep.subr.bf16.mxu1 %v779_v56 }
  0x3e   : > { %479 = vmatpush1.bf16.msra.mxu0 %v781_v57  ;;  %522 = vmatpush1.bf16.msra.mxu1 %v782_v58 }
  0x3f   : > { %480 = vmatprep.subr.bf16.mxu0 %v783_v59  ;;  %523 = vmatprep.subr.bf16.mxu1 %v785_v60 }
  0x42   : > { %481 = vmatpush1.bf16.msra.mxu0 %v787_v61  ;;  %524 = vmatpush1.bf16.msra.mxu1 %v788_v62 }
  0x43   : > { %482 = vmatprep.subr.bf16.mxu0 %v789_v63  ;;  %525 = vmatprep.subr.bf16.mxu1 %v791_v0 }
  0x46   : > { %483 = vmatpush1.bf16.msra.mxu0 %v793_v1  ;;  %526 = vmatpush1.bf16.msra.mxu1 %v794_v2 }
  0x49   : > { %501 = vmatmul.mubr.bf16.vlgmr.msra.gmra.mrb[0].mxu0 %v795_v3  ;;  %544 = vmatmul.mubr.bf16.vlgmr.msra.gmra.mrb[0].mxu1 %v795_v3 }
  0xa7   : > { %v300_v4 = vpop.permute.xlu0 %299 }
  0xab   : > { %v295_v29 = vpop.permute.xlu0 %294 }
 0x11c   : > { %v502_v5 = vpop.f32.mrb[0].mxu0  ;;  %v545_v6 = vpop.f32.mrb[0].mxu1 }
 0x11d   : > { %v504_v7 = vpop.f32.mrb[1].mxu0  ;;  %v547_v8 = vpop.f32.mrb[1].mxu1  ;;  %v503_v30 = vadd.f32 %v502_v5, %v295_v29  ;;  %v546_v31 = vadd.f32 %v545_v6, %v295_v29 }
 0x11e   : > { %v506_v9 = vpop.f32.mrb[2].mxu0  ;;  %v549_v10 = vpop.f32.mrb[2].mxu1  ;;  %v505_v32 = vadd.f32 %v504_v7, %v295_v29  ;;  %v548_v33 = vadd.f32 %v547_v8, %v295_v29 }
 0x11f   : > { %v507_v11 = vadd.f32 %v506_v9, %v300_v4  ;;  %v550_v12 = vadd.f32 %v549_v10, %v300_v4  ;;  %v508_v13 = vpop.f32.mrb[3].mxu0  ;;  %v551_v14 = vpop.f32.mrb[3].mxu1  ;;  %v554_v34 = vmax.f32 %v503_v30, 0.0  ;;  %v556_v36 = vmax.f32 %v546_v31, 0.0 }
 0x120   : > { %v509_v15 = vadd.f32 %v508_v13, %v300_v4  ;;  %v552_v16 = vadd.f32 %v551_v14, %v300_v4  ;;  %v555_v38 = vmax.f32 %v505_v32, 0.0  ;;  %v557_v41 = vmax.f32 %v548_v33, 0.0 }
 0x121   : > { %v710_v17 = vmul.f32 -1.442695, %v507_v11  ;;  %v712_v18 = vmul.f32 -1.442695, %v550_v12 }
 0x122   : > { %v711_v19 = vmul.f32 -1.442695, %v509_v15  ;;  %v713_v20 = vmul.f32 -1.442695, %v552_v16 }
 0x123   : > { %796 = vpow2.f32 %v710_v17 }
 0x124   : > { %798 = vpow2.f32 %v712_v18 }
 0x125   : > { %800 = vpow2.f32 %v711_v19 }
 0x126   : > { %802 = vpow2.f32 %v713_v20 }
 0x12d   : > { %v797_v21 = vpop.eup %796 }
 0x12e   : > { %v799_v22 = vpop.eup %798  ;;  %v570_v23 = vadd.f32 1.0, %v797_v21 }
 0x12f   : > { %v801_v24 = vpop.eup %800  ;;  %v572_v25 = vadd.f32 1.0, %v799_v22 }
 0x130   : > { %v803_v26 = vpop.eup %802  ;;  %804 = vrcp.f32 %v570_v23  ;;  %v571_v27 = vadd.f32 1.0, %v801_v24 }
 0x131   : > { %806 = vrcp.f32 %v572_v25  ;;  %v573_v28 = vadd.f32 1.0, %v803_v26 }
 0x132   : > { %808 = vrcp.f32 %v571_v27 }
 0x133   : > { %810 = vrcp.f32 %v573_v28 }
 0x13a   : > { %v805_v35 = vpop.eup %804 }
 0x13b   : > { %v807_v37 = vpop.eup %806  ;;  %v582_v39 = vmul.f32 %v805_v35, %v554_v34 }
 0x13c   : > { %v809_v40 = vpop.eup %808  ;;  %v584_v42 = vmul.f32 %v807_v37, %v556_v36 }
 0x13d   : > { %v811_v43 = vpop.eup %810  ;;  %v583_v44 = vmul.f32 %v809_v40, %v555_v38 }
 0x13e   : > { %v585_v45 = vmul.f32 %v811_v43, %v557_v41 }
 0x13f   : > { %v719_v46 = vpack.c.bf16 %v583_v44, %v582_v39 }
 0x140   : > { %v720_v47 = vpack.c.bf16 %v585_v45, %v584_v42 }
 0x141   : > { %602 = vst [vmem:[%s253_s14] sm:$0xff] %v719_v46 }
 0x142   : > { %603 = vst [vmem:[%s253_s14 + $0x8] sm:$0xff] %v720_v47 }
 0x143 PF: > { %p10_p9 = scmp.ge.s32.totalorder %s874_s16, 4   ;;  %s1024_s12 = smov %s830_s13 }
 0x144   : > { %s1025_s13 = smov %s883_s19  ;;  %s1026_s14 = smov %s874_s16 }
 0x145   :  { %12 = sbr.rel (!%p10_p9) target bundleno = 2 (0x2), region = 90 }

// kernel: down_block_forward.3
= control target key start
LH: loop header
LB: loop body
LE: loop exit
PB: predicated region body
PF: predicated region fallthrough
CT: control target
= control target key end

     0   :  { %s1181_s12 = smov 0   ;;  %s1183_s13 = smov 0   ;;  %s1443_s0 = inlined_call_operand.vmem [shape: bf16[256,1024], index: 0, kind: input, shape index: {}]   ;;  %s1444_s1 = inlined_call_operand.vmem [shape: bf16[16,256], index: 1, kind: input, shape index: {}]   ;;  %s1445_s2 = inlined_call_operand.vmem [shape: f32[16,1], index: 2, kind: input, shape index: {}]   ;;  %s1446_s3 = inlined_call_operand.vmem [shape: f32[8,1024], index: 3, kind: output, shape index: {}]  }
   0x1   :  { %s1185_s14 = smov 0  }
   0x2 LB: > { %s911_s15 = sadd.s32 4294967295, %s1158_s14   ;;  %s1198_s16 = sadd.s32 1, %s1158_s14   ;;  %s1158_s14 = sphi %s1185_s14, %s1449_s14   ;;  %s1154_s13 = sphi %s1183_s13, %s1448_s13   ;;  %s1150_s12 = sphi %s1181_s12, %s1447_s12  }
   0x3   : > { %s17_s17 = ssub.s32 %s1158_s14, %s1198_s16  ;;  %s20_s18 = sadd.s32 1, %s1154_s13 }
   0x4   : > { %p18_p0 = scmp.eq.s32.totalorder %s17_s17, 0  ;;  %p27_p1 = scmp.ne.s32.totalorder %s1154_s13, %s1150_s12 }
   0x5   : > { %p28_p2 = scmp.eq.s32.totalorder %s1158_s14, 0  ;;  %p914_p4 = scmp.ge.s32.totalorder %s1158_s14, 2 }
   0x6   : > { %s1207_s19 = scalar_select %p18_p0, %s1154_s13, %s20_s18  }
   0x7   : > { %p29_p3 = por %p28_p2, %p27_p1  ;;  %127 = sbr.rel (%p914_p4) target bundleno = 50 (0x32), region = 24 }
   0xe   : > { %130 = sbr.rel (!%p29_p3) target bundleno = 50 (0x32), region = 28  ;;  %s132_s20 = sand.u32 (%p29_p3), 1, %s1154_s13  }
   0xf   : > { %s994_s21 = sshll.u32 (%p29_p3), %s1158_s14, 4  ;;  %s915_s22 = sshll.u32 (%p29_p3), %s132_s20, 9 }
  0x10   : > { %s1215_s25 = scalar_lea.vmem (%p29_p3), %s1443_s0, %s994_s21  ;;  %s1220_s26 = scalar_lea.vmem (%p29_p3), [#allocation2], %s915_s22 }
  0x11   : > { %v150_v0 = vld [vmem:[%s1215_s25] sm:$0xff] (%p29_p3)  ;;  %v152_v1 = vld [vmem:[%s1215_s25 + $0x8] sm:$0xff] (%p29_p3) }
  0x12   : > { %v154_v2 = vld [vmem:[%s1215_s25 + $0x20] sm:$0xff] (%p29_p3)  ;;  %151 = vst [vmem:[%s1220_s26] sm:$0xff] (%p29_p3), %v150_v0  ;;  %153 = vst [vmem:[%s1220_s26 + $0x8] sm:$0xff] (%p29_p3), %v152_v1  ;;  %v156_v3 = vld [vmem:[%s1215_s25 + $0x28] sm:$0xff] (%p29_p3) }
  0x13   : > { %155 = vst [vmem:[%s1220_s26 + $0x10] sm:$0xff] (%p29_p3), %v154_v2  ;;  %v158_v4 = vld [vmem:[%s1215_s25 + $0x40] sm:$0xff] (%p29_p3)  ;;  %v160_v5 = vld [vmem:[%s1215_s25 + $0x48] sm:$0xff] (%p29_p3)  ;;  %157 = vst [vmem:[%s1220_s26 + $0x18] sm:$0xff] (%p29_p3), %v156_v3 }
  0x14   : > { %159 = vst [vmem:[%s1220_s26 + $0x20] sm:$0xff] (%p29_p3), %v158_v4  ;;  %161 = vst [vmem:[%s1220_s26 + $0x28] sm:$0xff] (%p29_p3), %v160_v5  ;;  %v162_v6 = vld [vmem:[%s1215_s25 + $0x60] sm:$0xff] (%p29_p3)  ;;  %v164_v7 = vld [vmem:[%s1215_s25 + $0x68] sm:$0xff] (%p29_p3) }
  0x15   : > { %v166_v8 = vld [vmem:[%s1215_s25 + $0x80] sm:$0xff]  ;;  %163 = vst [vmem:[%s1220_s26 + $0x30] sm:$0xff] %v162_v6  ;;  %165 = vst [vmem:[%s1220_s26 + $0x38] sm:$0xff] %v164_v7  ;;  %v168_v9 = vld [vmem:[%s1215_s25 + $0x88] sm:$0xff] }
  0x16   : > { %167 = vst [vmem:[%s1220_s26 + $0x40] sm:$0xff] %v166_v8  ;;  %v170_v10 = vld [vmem:[%s1215_s25 + $0xa0] sm:$0xff]  ;;  %v172_v11 = vld [vmem:[%s1215_s25 + $0xa8] sm:$0xff]  ;;  %169 = vst [vmem:[%s1220_s26 + $0x48] sm:$0xff] %v168_v9 }
  0x17   : > { %171 = vst [vmem:[%s1220_s26 + $0x50] sm:$0xff] %v170_v10  ;;  %173 = vst [vmem:[%s1220_s26 + $0x58] sm:$0xff] %v172_v11  ;;  %v174_v12 = vld [vmem:[%s1215_s25 + $0xc0] sm:$0xff]  ;;  %v176_v13 = vld [vmem:[%s1215_s25 + $0xc8] sm:$0xff] }
  0x18   : > { %v178_v14 = vld [vmem:[%s1215_s25 + $0xe0] sm:$0xff]  ;;  %175 = vst [vmem:[%s1220_s26 + $0x60] sm:$0xff] %v174_v12  ;;  %177 = vst [vmem:[%s1220_s26 + $0x68] sm:$0xff] %v176_v13  ;;  %v180_v15 = vld [vmem:[%s1215_s25 + $0xe8] sm:$0xff] }
  0x19   : > { %179 = vst [vmem:[%s1220_s26 + $0x70] sm:$0xff] %v178_v14  ;;  %v182_v16 = vld [vmem:[%s1215_s25 + $0x100] sm:$0xff]  ;;  %v184_v17 = vld [vmem:[%s1215_s25 + $0x108] sm:$0xff]  ;;  %181 = vst [vmem:[%s1220_s26 + $0x78] sm:$0xff] %v180_v15 }
  0x1a   : > { %183 = vst [vmem:[%s1220_s26 + $0x80] sm:$0xff] %v182_v16  ;;  %185 = vst [vmem:[%s1220_s26 + $0x88] sm:$0xff] %v184_v17  ;;  %v186_v18 = vld [vmem:[%s1215_s25 + $0x120] sm:$0xff]  ;;  %v188_v19 = vld [vmem:[%s1215_s25 + $0x128] sm:$0xff] }
  0x1b   : > { %v190_v20 = vld [vmem:[%s1215_s25 + $0x140] sm:$0xff]  ;;  %187 = vst [vmem:[%s1220_s26 + $0x90] sm:$0xff] %v186_v18  ;;  %189 = vst [vmem:[%s1220_s26 + $0x98] sm:$0xff] %v188_v19  ;;  %v192_v21 = vld [vmem:[%s1215_s25 + $0x148] sm:$0xff] }
  0x1c   : > { %191 = vst [vmem:[%s1220_s26 + $0xa0] sm:$0xff] %v190_v20  ;;  %v194_v22 = vld [vmem:[%s1215_s25 + $0x160] sm:$0xff]  ;;  %v196_v23 = vld [vmem:[%s1215_s25 + $0x168] sm:$0xff]  ;;  %193 = vst [vmem:[%s1220_s26 + $0xa8] sm:$0xff] %v192_v21 }
  0x1d   : > { %195 = vst [vmem:[%s1220_s26 + $0xb0] sm:$0xff] %v194_v22  ;;  %197 = vst [vmem:[%s1220_s26 + $0xb8] sm:$0xff] %v196_v23  ;;  %v198_v24 = vld [vmem:[%s1215_s25 + $0x180] sm:$0xff]  ;;  %v200_v25 = vld [vmem:[%s1215_s25 + $0x188] sm:$0xff] }
  0x1e   : > { %v202_v26 = vld [vmem:[%s1215_s25 + $0x1a0] sm:$0xff]  ;;  %199 = vst [vmem:[%s1220_s26 + $0xc0] sm:$0xff] %v198_v24  ;;  %201 = vst [vmem:[%s1220_s26 + $0xc8] sm:$0xff] %v200_v25  ;;  %v204_v27 = vld [vmem:[%s1215_s25 + $0x1a8] sm:$0xff] }
  0x1f   : > { %203 = vst [vmem:[%s1220_s26 + $0xd0] sm:$0xff] %v202_v26  ;;  %v206_v28 = vld [vmem:[%s1215_s25 + $0x1c0] sm:$0xff]  ;;  %v208_v29 = vld [vmem:[%s1215_s25 + $0x1c8] sm:$0xff]  ;;  %205 = vst [vmem:[%s1220_s26 + $0xd8] sm:$0xff] %v204_v27 }
  0x20   : > { %207 = vst [vmem:[%s1220_s26 + $0xe0] sm:$0xff] %v206_v28  ;;  %209 = vst [vmem:[%s1220_s26 + $0xe8] sm:$0xff] %v208_v29  ;;  %v210_v30 = vld [vmem:[%s1215_s25 + $0x1e0] sm:$0xff]  ;;  %v212_v31 = vld [vmem:[%s1215_s25 + $0x1e8] sm:$0xff] }
  0x21   : > { %v214_v32 = vld [vmem:[%s1215_s25 + $0x200] sm:$0xff]  ;;  %211 = vst [vmem:[%s1220_s26 + $0xf0] sm:$0xff] %v210_v30  ;;  %213 = vst [vmem:[%s1220_s26 + $0xf8] sm:$0xff] %v212_v31  ;;  %v216_v33 = vld [vmem:[%s1215_s25 + $0x208] sm:$0xff] }
  0x22   : > { %215 = vst [vmem:[%s1220_s26 + $0x100] sm:$0xff] %v214_v32  ;;  %v218_v34 = vld [vmem:[%s1215_s25 + $0x220] sm:$0xff]  ;;  %v220_v35 = vld [vmem:[%s1215_s25 + $0x228] sm:$0xff]  ;;  %217 = vst [vmem:[%s1220_s26 + $0x108] sm:$0xff] %v216_v33 }
  0x23   : > { %219 = vst [vmem:[%s1220_s26 + $0x110] sm:$0xff] %v218_v34  ;;  %221 = vst [vmem:[%s1220_s26 + $0x118] sm:$0xff] %v220_v35  ;;  %v222_v36 = vld [vmem:[%s1215_s25 + $0x240] sm:$0xff]  ;;  %v224_v37 = vld [vmem:[%s1215_s25 + $0x248] sm:$0xff] }
  0x24   : > { %v226_v38 = vld [vmem:[%s1215_s25 + $0x260] sm:$0xff]  ;;  %223 = vst [vmem:[%s1220_s26 + $0x120] sm:$0xff] %v222_v36  ;;  %225 = vst [vmem:[%s1220_s26 + $0x128] sm:$0xff] %v224_v37  ;;  %v228_v39 = vld [vmem:[%s1215_s25 + $0x268] sm:$0xff] }
  0x25   : > { %227 = vst [vmem:[%s1220_s26 + $0x130] sm:$0xff] %v226_v38  ;;  %v230_v40 = vld [vmem:[%s1215_s25 + $0x280] sm:$0xff]  ;;  %v232_v41 = vld [vmem:[%s1215_s25 + $0x288] sm:$0xff]  ;;  %229 = vst [vmem:[%s1220_s26 + $0x138] sm:$0xff] %v228_v39 }
  0x26   : > { %231 = vst [vmem:[%s1220_s26 + $0x140] sm:$0xff] %v230_v40  ;;  %233 = vst [vmem:[%s1220_s26 + $0x148] sm:$0xff] %v232_v41  ;;  %v234_v42 = vld [vmem:[%s1215_s25 + $0x2a0] sm:$0xff]  ;;  %v236_v43 = vld [vmem:[%s1215_s25 + $0x2a8] sm:$0xff] }
  0x27   : > { %v238_v44 = vld [vmem:[%s1215_s25 + $0x2c0] sm:$0xff]  ;;  %235 = vst [vmem:[%s1220_s26 + $0x150] sm:$0xff] %v234_v42  ;;  %237 = vst [vmem:[%s1220_s26 + $0x158] sm:$0xff] %v236_v43  ;;  %v240_v45 = vld [vmem:[%s1215_s25 + $0x2c8] sm:$0xff] }
  0x28   : > { %239 = vst [vmem:[%s1220_s26 + $0x160] sm:$0xff] %v238_v44  ;;  %v242_v46 = vld [vmem:[%s1215_s25 + $0x2e0] sm:$0xff]  ;;  %v244_v47 = vld [vmem:[%s1215_s25 + $0x2e8] sm:$0xff]  ;;  %241 = vst [vmem:[%s1220_s26 + $0x168] sm:$0xff] %v240_v45 }
  0x29   : > { %243 = vst [vmem:[%s1220_s26 + $0x170] sm:$0xff] %v242_v46  ;;  %245 = vst [vmem:[%s1220_s26 + $0x178] sm:$0xff] %v244_v47  ;;  %v246_v48 = vld [vmem:[%s1215_s25 + $0x300] sm:$0xff]  ;;  %v248_v49 = vld [vmem:[%s1215_s25 + $0x308] sm:$0xff] }
  0x2a   : > { %v250_v50 = vld [vmem:[%s1215_s25 + $0x320] sm:$0xff]  ;;  %247 = vst [vmem:[%s1220_s26 + $0x180] sm:$0xff] %v246_v48  ;;  %249 = vst [vmem:[%s1220_s26 + $0x188] sm:$0xff] %v248_v49  ;;  %v252_v51 = vld [vmem:[%s1215_s25 + $0x328] sm:$0xff] }
  0x2b   : > { %251 = vst [vmem:[%s1220_s26 + $0x190] sm:$0xff] %v250_v50  ;;  %v254_v52 = vld [vmem:[%s1215_s25 + $0x340] sm:$0xff]  ;;  %v256_v53 = vld [vmem:[%s1215_s25 + $0x348] sm:$0xff]  ;;  %253 = vst [vmem:[%s1220_s26 + $0x198] sm:$0xff] %v252_v51 }
  0x2c   : > { %255 = vst [vmem:[%s1220_s26 + $0x1a0] sm:$0xff] %v254_v52  ;;  %257 = vst [vmem:[%s1220_s26 + $0x1a8] sm:$0xff] %v256_v53  ;;  %v258_v54 = vld [vmem:[%s1215_s25 + $0x360] sm:$0xff]  ;;  %v260_v55 = vld [vmem:[%s1215_s25 + $0x368] sm:$0xff] }
  0x2d   : > { %v262_v56 = vld [vmem:[%s1215_s25 + $0x380] sm:$0xff]  ;;  %259 = vst [vmem:[%s1220_s26 + $0x1b0] sm:$0xff] %v258_v54  ;;  %261 = vst [vmem:[%s1220_s26 + $0x1b8] sm:$0xff] %v260_v55  ;;  %v264_v57 = vld [vmem:[%s1215_s25 + $0x388] sm:$0xff] }
  0x2e   : > { %263 = vst [vmem:[%s1220_s26 + $0x1c0] sm:$0xff] %v262_v56  ;;  %v266_v58 = vld [vmem:[%s1215_s25 + $0x3a0] sm:$0xff]  ;;  %v268_v59 = vld [vmem:[%s1215_s25 + $0x3a8] sm:$0xff]  ;;  %265 = vst [vmem:[%s1220_s26 + $0x1c8] sm:$0xff] %v264_v57 }
  0x2f   : > { %267 = vst [vmem:[%s1220_s26 + $0x1d0] sm:$0xff] %v266_v58  ;;  %269 = vst [vmem:[%s1220_s26 + $0x1d8] sm:$0xff] %v268_v59  ;;  %v270_v60 = vld [vmem:[%s1215_s25 + $0x3c0] sm:$0xff]  ;;  %v272_v61 = vld [vmem:[%s1215_s25 + $0x3c8] sm:$0xff] }
  0x30   : > { %v274_v62 = vld [vmem:[%s1215_s25 + $0x3e0] sm:$0xff]  ;;  %271 = vst [vmem:[%s1220_s26 + $0x1e0] sm:$0xff] %v270_v60  ;;  %273 = vst [vmem:[%s1220_s26 + $0x1e8] sm:$0xff] %v272_v61  ;;  %v276_v63 = vld [vmem:[%s1215_s25 + $0x3e8] sm:$0xff] }
  0x31   : > { %275 = vst [vmem:[%s1220_s26 + $0x1f0] sm:$0xff] %v274_v62  ;;  %277 = vst [vmem:[%s1220_s26 + $0x1f8] sm:$0xff] %v276_v63 }
  0x32 PF: > { %p918_p5 = scmp.ge.s32.totalorder %s1158_s14, 1  ;;  %p282_p6 = scmp.lt.s32.totalorder %s1158_s14, 3 }
  0x34   : > { %p283_p7 = pnand %p918_p5, %p282_p6 }
  0x35   : > { %s289_s27 = sand.u32 (!%p283_p7), 1, %s1150_s12   ;;  %v1119_v0 = vld [vmem:[%s1444_s1 + $0x4] ss:$8 sps:$4 sm:$0xff] (!%p283_p7)   ;;  %v1160_v1 = vmov (!%p283_p7), 0   ;;  %s920_s11 = sshll.u32 (!%p283_p7), %s911_s15, 2 }
  0x36   : > { %286 = sbr.rel (%p283_p7) target bundleno = 369 (0x171), region = 51  ;;  %s919_s28 = sshll.u32 (!%p283_p7), %s289_s27, 9  ;;  %1020 = vset.pattern.permute.xlu0 (!%p283_p7), %v1160_v1  ;;  %v386_v2 = vld [vmem:[%s1445_s2 + $0x8] sm:$0xff] (!%p283_p7)  ;;  %v385_v3 = vld [vmem:[%s1445_s2] sm:$0xff] (!%p283_p7)  ;;  %759 = vmatprep.mubr.bf16.mxu0 (!%p283_p7), %v1119_v0 }
  0x37   : > { %394 = vperm.xlu0 (!%p283_p7), %1020, %v386_v2   ;;  %s1359_s8 = scalar_lea.vmem (!%p283_p7), [#allocation2], %s919_s28  ;;  %802 = vmatprep.mubr.bf16.mxu1 (!%p283_p7), %v1119_v0  ;;  %p314_p8 = scmp.lt.s32.totalorder (!%p283_p7), %s920_s11, 7 }
  0x38   : > { %v1021_v4 = vld [vmem:[%s1359_s8 + $0x4] ss:$16 sps:$4 sm:$0xff] (!%p283_p7)   ;;  %v1023_v5 = vld [vmem:[%s1359_s8 + $0xc] ss:$16 sps:$4 sm:$0xff] (!%p283_p7)   ;;  %v1025_v6 = vld [vmem:[%s1359_s8] ss:$16 sps:$4 sm:$0xff] (!%p283_p7)  }
  0x39   : > { %727 = vmatprep.subr.bf16.mxu0 (!%p283_p7), %v1021_v4  ;;  %v1026_v7 = vld [vmem:[%s1359_s8 + $0x8] ss:$16 sps:$4 sm:$0xff] (!%p283_p7)   ;;  %770 = vmatprep.subr.bf16.mxu1 (!%p283_p7), %v1023_v5  ;;  %v1027_v8 = vld [vmem:[%s1359_s8 + $0x24] ss:$16 sps:$4 sm:$0xff] (!%p283_p7)   ;;  %v1029_v9 = vld [vmem:[%s1359_s8 + $0x2c] ss:$16 sps:$4 sm:$0xff] (!%p283_p7)  }
  0x3a   : > { %728 = vmatpush1.bf16.msra.mxu0 (!%p283_p7), %v1025_v6  ;;  %771 = vmatpush1.bf16.msra.mxu1 (!%p283_p7), %v1026_v7  ;;  %v1031_v10 = vld [vmem:[%s1359_s8 + $0x20] ss:$16 sps:$4 sm:$0xff] (!%p283_p7)   ;;  %v1032_v11 = vld [vmem:[%s1359_s8 + $0x28] ss:$16 sps:$4 sm:$0xff] (!%p283_p7)   ;;  %v1033_v12 = vld [vmem:[%s1359_s8 + $0x44] ss:$16 sps:$4 sm:$0xff] (!%p283_p7)  }
  0x3b   : > { %389 = vperm.xlu0 (!%p283_p7), %1020, %v385_v3   ;;  %729 = vmatprep.subr.bf16.mxu0 (!%p283_p7), %v1027_v8  ;;  %v1035_v13 = vld [vmem:[%s1359_s8 + $0x4c] ss:$16 sps:$4 sm:$0xff] (!%p283_p7)   ;;  %v1037_v14 = vld [vmem:[%s1359_s8 + $0x40] ss:$16 sps:$4 sm:$0xff] (!%p283_p7)   ;;  %v1038_v15 = vld [vmem:[%s1359_s8 + $0x48] ss:$16 sps:$4 sm:$0xff] (!%p283_p7)  }
  0x3c   : > { %772 = vmatprep.subr.bf16.mxu1 (!%p283_p7), %v1029_v9  ;;  %v1039_v16 = vld [vmem:[%s1359_s8 + $0x64] ss:$16 sps:$4 sm:$0xff] (!%p283_p7)   ;;  %v1041_v17 = vld [vmem:[%s1359_s8 + $0x6c] ss:$16 sps:$4 sm:$0xff] (!%p283_p7)   ;;  %v1043_v18 = vld [vmem:[%s1359_s8 + $0x60] ss:$16 sps:$4 sm:$0xff] (!%p283_p7)  }
  0x3d   : > { %v1044_v19 = vld [vmem:[%s1359_s8 + $0x68] ss:$16 sps:$4 sm:$0xff]   ;;  %v1045_v20 = vld [vmem:[%s1359_s8 + $0x84] ss:$16 sps:$4 sm:$0xff]   ;;  %v1047_v21 = vld [vmem:[%s1359_s8 + $0x8c] ss:$16 sps:$4 sm:$0xff]  }
  0x3e   : > { %730 = vmatpush1.bf16.msra.mxu0 %v1031_v10  ;;  %773 = vmatpush1.bf16.msra.mxu1 %v1032_v11  ;;  %v1049_v22 = vld [vmem:[%s1359_s8 + $0x80] ss:$16 sps:$4 sm:$0xff]   ;;  %v1050_v23 = vld [vmem:[%s1359_s8 + $0x88] ss:$16 sps:$4 sm:$0xff]   ;;  %v1051_v24 = vld [vmem:[%s1359_s8 + $0xa4] ss:$16 sps:$4 sm:$0xff]  }
  0x3f   : > { %731 = vmatprep.subr.bf16.mxu0 %v1033_v12  ;;  %774 = vmatprep.subr.bf16.mxu1 %v1035_v13  ;;  %v1053_v25 = vld [vmem:[%s1359_s8 + $0xac] ss:$16 sps:$4 sm:$0xff]   ;;  %v1055_v26 = vld [vmem:[%s1359_s8 + $0xa0] ss:$16 sps:$4 sm:$0xff]   ;;  %v1056_v27 = vld [vmem:[%s1359_s8 + $0xa8] ss:$16 sps:$4 sm:$0xff]  }
  0x40   : > { %v1057_v28 = vld [vmem:[%s1359_s8 + $0xc4] ss:$16 sps:$4 sm:$0xff]   ;;  %v1059_v29 = vld [vmem:[%s1359_s8 + $0xcc] ss:$16 sps:$4 sm:$0xff]   ;;  %v1061_v30 = vld [vmem:[%s1359_s8 + $0xc0] ss:$16 sps:$4 sm:$0xff]  }
  0x41   : > { %v1062_v31 = vld [vmem:[%s1359_s8 + $0xc8] ss:$16 sps:$4 sm:$0xff]   ;;  %v1063_v32 = vld [vmem:[%s1359_s8 + $0xe4] ss:$16 sps:$4 sm:$0xff]   ;;  %v1065_v33 = vld [vmem:[%s1359_s8 + $0xec] ss:$16 sps:$4 sm:$0xff]  }
  0x42   : > { %732 = vmatpush1.bf16.msra.mxu0 %v1037_v14  ;;  %775 = vmatpush1.bf16.msra.mxu1 %v1038_v15  ;;  %v1067_v34 = vld [vmem:[%s1359_s8 + $0xe0] ss:$16 sps:$4 sm:$0xff]   ;;  %v1068_v35 = vld [vmem:[%s1359_s8 + $0xe8] ss:$16 sps:$4 sm:$0xff]   ;;  %v1069_v36 = vld [vmem:[%s1359_s8 + $0x104] ss:$16 sps:$4 sm:$0xff]  }
  0x43   : > { %733 = vmatprep.subr.bf16.mxu0 %v1039_v16  ;;  %776 = vmatprep.subr.bf16.mxu1 %v1041_v17  ;;  %v1071_v37 = vld [vmem:[%s1359_s8 + $0x10c] ss:$16 sps:$4 sm:$0xff]   ;;  %v1073_v38 = vld [vmem:[%s1359_s8 + $0x100] ss:$16 sps:$4 sm:$0xff]   ;;  %v1074_v39 = vld [vmem:[%s1359_s8 + $0x108] ss:$16 sps:$4 sm:$0xff]  }
  0x44   : > { %v1075_v40 = vld [vmem:[%s1359_s8 + $0x124] ss:$16 sps:$4 sm:$0xff]   ;;  %v1077_v41 = vld [vmem:[%s1359_s8 + $0x12c] ss:$16 sps:$4 sm:$0xff]   ;;  %v1079_v42 = vld [vmem:[%s1359_s8 + $0x120] ss:$16 sps:$4 sm:$0xff]  }
  0x45   : > { %v1080_v43 = vld [vmem:[%s1359_s8 + $0x128] ss:$16 sps:$4 sm:$0xff]   ;;  %v1081_v44 = vld [vmem:[%s1359_s8 + $0x144] ss:$16 sps:$4 sm:$0xff]   ;;  %v1083_v45 = vld [vmem:[%s1359_s8 + $0x14c] ss:$16 sps:$4 sm:$0xff]  }
  0x46   : > { %734 = vmatpush1.bf16.msra.mxu0 %v1043_v18  ;;  %777 = vmatpush1.bf16.msra.mxu1 %v1044_v19  ;;  %v1085_v46 = vld [vmem:[%s1359_s8 + $0x140] ss:$16 sps:$4 sm:$0xff]   ;;  %v1086_v47 = vld [vmem:[%s1359_s8 + $0x148] ss:$16 sps:$4 sm:$0xff]   ;;  %v1087_v48 = vld [vmem:[%s1359_s8 + $0x164] ss:$16 sps:$4 sm:$0xff]  }
  0x47   : > { %735 = vmatprep.subr.bf16.mxu0 %v1045_v20  ;;  %778 = vmatprep.subr.bf16.mxu1 %v1047_v21  ;;  %v1089_v49 = vld [vmem:[%s1359_s8 + $0x16c] ss:$16 sps:$4 sm:$0xff]   ;;  %v1091_v50 = vld [vmem:[%s1359_s8 + $0x160] ss:$16 sps:$4 sm:$0xff]   ;;  %v1092_v51 = vld [vmem:[%s1359_s8 + $0x168] ss:$16 sps:$4 sm:$0xff]  }
  0x48   : > { %v1093_v52 = vld [vmem:[%s1359_s8 + $0x184] ss:$16 sps:$4 sm:$0xff]   ;;  %v1095_v53 = vld [vmem:[%s1359_s8 + $0x18c] ss:$16 sps:$4 sm:$0xff]   ;;  %v1097_v54 = vld [vmem:[%s1359_s8 + $0x180] ss:$16 sps:$4 sm:$0xff]  }
  0x49   : > { %v1098_v55 = vld [vmem:[%s1359_s8 + $0x188] ss:$16 sps:$4 sm:$0xff]   ;;  %v1099_v56 = vld [vmem:[%s1359_s8 + $0x1a4] ss:$16 sps:$4 sm:$0xff]   ;;  %v1101_v57 = vld [vmem:[%s1359_s8 + $0x1ac] ss:$16 sps:$4 sm:$0xff]  }
  0x4a   : > { %736 = vmatpush1.bf16.msra.mxu0 %v1049_v22  ;;  %779 = vmatpush1.bf16.msra.mxu1 %v1050_v23  ;;  %v1103_v58 = vld [vmem:[%s1359_s8 + $0x1a0] ss:$16 sps:$4 sm:$0xff]   ;;  %v1104_v59 = vld [vmem:[%s1359_s8 + $0x1a8] ss:$16 sps:$4 sm:$0xff]   ;;  %v1105_v60 = vld [vmem:[%s1359_s8 + $0x1c4] ss:$16 sps:$4 sm:$0xff]  }
  0x4b   : > { %737 = vmatprep.subr.bf16.mxu0 %v1051_v24  ;;  %780 = vmatprep.subr.bf16.mxu1 %v1053_v25  ;;  %v1107_v61 = vld [vmem:[%s1359_s8 + $0x1cc] ss:$16 sps:$4 sm:$0xff]   ;;  %v1109_v62 = vld [vmem:[%s1359_s8 + $0x1c0] ss:$16 sps:$4 sm:$0xff]   ;;  %v1110_v63 = vld [vmem:[%s1359_s8 + $0x1c8] ss:$16 sps:$4 sm:$0xff]  }
  0x4c   : > { %v1111_v0 = vld [vmem:[%s1359_s8 + $0x1e4] ss:$16 sps:$4 sm:$0xff]   ;;  %v1113_v1 = vld [vmem:[%s1359_s8 + $0x1ec] ss:$16 sps:$4 sm:$0xff]   ;;  %v1115_v2 = vld [vmem:[%s1359_s8 + $0x1e0] ss:$16 sps:$4 sm:$0xff]  }
  0x4d   : > { %v1116_v3 = vld [vmem:[%s1359_s8 + $0x1e8] ss:$16 sps:$4 sm:$0xff]   ;;  %s1451_s11 = smov (!%p314_p8, %s920_s11), 7 }
  0x4e   : > { %738 = vmatpush1.bf16.msra.mxu0 %v1055_v26  ;;  %781 = vmatpush1.bf16.msra.mxu1 %v1056_v27  ;;  %v1117_v4 = vld [vmem:[%s1444_s1] ss:$8 sps:$4 sm:$0xff]   ;;  %s921_s12 = sshll.u32 %s1451_s11, 3 }
  0x4f   : > { %739 = vmatprep.subr.bf16.mxu0 %v1057_v28  ;;  %782 = vmatprep.subr.bf16.mxu1 %v1059_v29  ;;  %s317_s17 = scalar_lea.vmem %s1446_s3, %s921_s12 }
  0x52   : > { %740 = vmatpush1.bf16.msra.mxu0 %v1061_v30  ;;  %783 = vmatpush1.bf16.msra.mxu1 %v1062_v31 }
  0x53   : > { %741 = vmatprep.subr.bf16.mxu0 %v1063_v32  ;;  %784 = vmatprep.subr.bf16.mxu1 %v1065_v33 }
  0x56   : > { %742 = vmatpush1.bf16.msra.mxu0 %v1067_v34  ;;  %785 = vmatpush1.bf16.msra.mxu1 %v1068_v35 }
  0x57   : > { %743 = vmatprep.subr.bf16.mxu0 %v1069_v36  ;;  %786 = vmatprep.subr.bf16.mxu1 %v1071_v37 }
  0x5a   : > { %744 = vmatpush1.bf16.msra.mxu0 %v1073_v38  ;;  %787 = vmatpush1.bf16.msra.mxu1 %v1074_v39 }
  0x5b   : > { %745 = vmatprep.subr.bf16.mxu0 %v1075_v40  ;;  %788 = vmatprep.subr.bf16.mxu1 %v1077_v41 }
  0x5e   : > { %746 = vmatpush1.bf16.msra.mxu0 %v1079_v42  ;;  %789 = vmatpush1.bf16.msra.mxu1 %v1080_v43 }
  0x5f   : > { %747 = vmatprep.subr.bf16.mxu0 %v1081_v44  ;;  %790 = vmatprep.subr.bf16.mxu1 %v1083_v45 }
  0x62   : > { %748 = vmatpush1.bf16.msra.mxu0 %v1085_v46  ;;  %791 = vmatpush1.bf16.msra.mxu1 %v1086_v47 }
  0x63   : > { %749 = vmatprep.subr.bf16.mxu0 %v1087_v48  ;;  %792 = vmatprep.subr.bf16.mxu1 %v1089_v49 }
  0x66   : > { %750 = vmatpush1.bf16.msra.mxu0 %v1091_v50  ;;  %793 = vmatpush1.bf16.msra.mxu1 %v1092_v51 }
  0x67   : > { %751 = vmatprep.subr.bf16.mxu0 %v1093_v52  ;;  %794 = vmatprep.subr.bf16.mxu1 %v1095_v53 }
  0x6a   : > { %752 = vmatpush1.bf16.msra.mxu0 %v1097_v54  ;;  %795 = vmatpush1.bf16.msra.mxu1 %v1098_v55 }
  0x6b   : > { %753 = vmatprep.subr.bf16.mxu0 %v1099_v56  ;;  %796 = vmatprep.subr.bf16.mxu1 %v1101_v57 }
  0x6e   : > { %754 = vmatpush1.bf16.msra.mxu0 %v1103_v58  ;;  %797 = vmatpush1.bf16.msra.mxu1 %v1104_v59 }
  0x6f   : > { %755 = vmatprep.subr.bf16.mxu0 %v1105_v60  ;;  %798 = vmatprep.subr.bf16.mxu1 %v1107_v61 }
  0x72   : > { %756 = vmatpush1.bf16.msra.mxu0 %v1109_v62  ;;  %799 = vmatpush1.bf16.msra.mxu1 %v1110_v63 }
  0x73   : > { %757 = vmatprep.subr.bf16.mxu0 %v1111_v0  ;;  %800 = vmatprep.subr.bf16.mxu1 %v1113_v1 }
  0x76   : > { %758 = vmatpush1.bf16.msra.mxu0 %v1115_v2  ;;  %801 = vmatpush1.bf16.msra.mxu1 %v1116_v3 }
  0x79   : > { %760 = vmatmul.mubr.bf16.vlgmr.msra.gmra.mrb[0].mxu0 %v1117_v4  ;;  %803 = vmatmul.mubr.bf16.vlgmr.msra.gmra.mrb[0].mxu1 %v1117_v4 }
  0xb6   : > { %v395_v5 = vpop.permute.xlu0 %394 }
  0xba   : > { %v390_v30 = vpop.permute.xlu0 %389 }
 0x14c   : > { %v761_v6 = vpop.f32.mrb[0].mxu0  ;;  %v804_v7 = vpop.f32.mrb[0].mxu1 }
 0x14d   : > { %v763_v8 = vpop.f32.mrb[1].mxu0  ;;  %v806_v9 = vpop.f32.mrb[1].mxu1  ;;  %v762_v31 = vadd.f32 %v761_v6, %v390_v30  ;;  %v805_v32 = vadd.f32 %v804_v7, %v390_v30 }
 0x14e   : > { %v765_v10 = vpop.f32.mrb[2].mxu0  ;;  %v808_v11 = vpop.f32.mrb[2].mxu1  ;;  %v764_v33 = vadd.f32 %v763_v8, %v390_v30  ;;  %v807_v34 = vadd.f32 %v806_v9, %v390_v30 }
 0x14f   : > { %v766_v12 = vadd.f32 %v765_v10, %v395_v5  ;;  %v809_v13 = vadd.f32 %v808_v11, %v395_v5  ;;  %v767_v14 = vpop.f32.mrb[3].mxu0  ;;  %v810_v15 = vpop.f32.mrb[3].mxu1  ;;  %v813_v35 = vmax.f32 %v762_v31, 0.0  ;;  %v815_v37 = vmax.f32 %v805_v32, 0.0 }
 0x150   : > { %v768_v16 = vadd.f32 %v767_v14, %v395_v5  ;;  %v811_v17 = vadd.f32 %v810_v15, %v395_v5  ;;  %v814_v39 = vmax.f32 %v764_v33, 0.0  ;;  %v816_v42 = vmax.f32 %v807_v34, 0.0 }
 0x151   : > { %v988_v18 = vmul.f32 -1.442695, %v766_v12  ;;  %v990_v19 = vmul.f32 -1.442695, %v809_v13 }
 0x152   : > { %v989_v20 = vmul.f32 -1.442695, %v768_v16  ;;  %v991_v21 = vmul.f32 -1.442695, %v811_v17 }
 0x153   : > { %1120 = vpow2.f32 %v988_v18 }
 0x154   : > { %1122 = vpow2.f32 %v990_v19 }
 0x155   : > { %1124 = vpow2.f32 %v989_v20 }
 0x156   : > { %1126 = vpow2.f32 %v991_v21 }
 0x15d   : > { %v1121_v22 = vpop.eup %1120 }
 0x15e   : > { %v1123_v23 = vpop.eup %1122  ;;  %v829_v24 = vadd.f32 1.0, %v1121_v22 }
 0x15f   : > { %v1125_v25 = vpop.eup %1124  ;;  %v831_v26 = vadd.f32 1.0, %v1123_v23 }
 0x160   : > { %v1127_v27 = vpop.eup %1126  ;;  %1128 = vrcp.f32 %v829_v24  ;;  %v830_v28 = vadd.f32 1.0, %v1125_v25 }
 0x161   : > { %1130 = vrcp.f32 %v831_v26  ;;  %v832_v29 = vadd.f32 1.0, %v1127_v27 }
 0x162   : > { %1132 = vrcp.f32 %v830_v28 }
 0x163   : > { %1134 = vrcp.f32 %v832_v29 }
 0x16a   : > { %v1129_v36 = vpop.eup %1128 }
 0x16b   : > { %v1131_v38 = vpop.eup %1130  ;;  %v841_v40 = vmul.f32 %v1129_v36, %v813_v35 }
 0x16c   : > { %v1133_v41 = vpop.eup %1132  ;;  %v843_v43 = vmul.f32 %v1131_v38, %v815_v37 }
 0x16d   : > { %v1135_v44 = vpop.eup %1134  ;;  %845 = vst [vmem:[%s317_s17] sm:$0xff] %v841_v40  ;;  %v842_v45 = vmul.f32 %v1133_v41, %v814_v39 }
 0x16e   : > { %v844_v46 = vmul.f32 %v1135_v44, %v816_v42  ;;  %847 = vst [vmem:[%s317_s17 + $0x10] sm:$0xff] %v843_v43 }
 0x16f   : > { %846 = vst [vmem:[%s317_s17 + $0x8] sm:$0xff] %v842_v45 }
 0x170   : > { %848 = vst [vmem:[%s317_s17 + $0x18] sm:$0xff] %v844_v46 }
 0x171 PF: > { %p10_p9 = scmp.ge.s32.totalorder %s1198_s16, 4   ;;  %s1447_s12 = smov %s1154_s13 }
 0x172   : > { %s1448_s13 = smov %s1207_s19  ;;  %s1449_s14 = smov %s1198_s16 }
 0x173   :  { %12 = sbr.rel (!%p10_p9) target bundleno = 2 (0x2), region = 90 }

</bundles_post_ra>
